<compile_context>
chip_gen: v5e
topology: v5e:2x2
jax: 0.10.0
libtpu: 0.0.40
codegen_flags: <defaults>
</compile_context>

<pallas_src>
import functools

import numpy as np

import jax
import jax.numpy as jnp
from jax.experimental import pallas as pl
from jax.experimental.pallas import tpu as pltpu


# --------------------------------------------------------------------------- kernel

def _cnn_encoder_kernel(x_ref, wim_ref, mask_ref, wo_ref, bo_ref, out_ref):
    """Fused im2col-conv -> masked global max-pool -> ReLU -> Linear -> tanh.

    x_ref    : [tb, src_len, emb]       f32  (raw embedded rows; cast + pad in-kernel)
    wim_ref  : [max_fs*emb, n_chan]     bf16 (im2col conv-weight slab, all filter sizes)
    mask_ref : [t_out_pad, n_chan]      f32  (0.0 valid, -1e30 invalid conv position)
    wo_ref   : [n_chan, h_pad]          f32  (Linear weight, hidden padded to 128 lanes)
    bo_ref   : [1, h_pad]               f32
    out_ref  : [tb, h_pad]              f32
    """
    tb, src_len, emb = x_ref.shape
    k_dim, n_chan = wim_ref.shape
    max_fs = k_dim // emb
    t_out = mask_ref.shape[0]
    pad_l = max_fs // 2
    pad_r = (t_out + max_fs - 1) - pad_l - src_len

    # bf16 cast in-kernel (cheap VPU work hidden under the MXU), zero-pad the seq.
    x = x_ref[...].astype(jnp.bfloat16)
    parts = []
    if pad_l > 0:
        parts.append(jnp.zeros((tb, pad_l, emb), jnp.bfloat16))
    parts.append(x)
    if pad_r > 0:
        parts.append(jnp.zeros((tb, pad_r, emb), jnp.bfloat16))
    xp = parts[0] if len(parts) == 1 else jnp.concatenate(parts, axis=1)  # [tb, s_pad, emb]

    # im2col: lane-dense LHS [tb*t_out, max_fs*emb]; t_out is a multiple of 8 so the
    # reshape collapsing (tb, t_out) is sublane-tile aligned.
    win = jnp.concatenate([xp[:, k:k + t_out, :] for k in range(max_fs)], axis=-1)
    acc = jnp.dot(win.reshape(tb * t_out, k_dim), wim_ref[...],
                  preferred_element_type=jnp.float32)            # single MXU matmul
    acc = acc.reshape(tb, t_out, n_chan)

    # Masked global max-pool; ReLU after the max (bias-free conv + monotone ReLU
    # => identical to PyTorch's relu-then-maxpool).
    pooled = jnp.maximum(jnp.max(acc + mask_ref[...], axis=1), 0.0)   # [tb, n_chan]

    # TODO(synk): dropout_p > 0 (training-time nn.Dropout) not implemented; module default is 0.
    out = jnp.tanh(jnp.dot(pooled, wo_ref[...], preferred_element_type=jnp.float32)
                   + bo_ref[...])
    out_ref[...] = out.astype(out_ref.dtype)                     # lane-dense 2-D store


# --------------------------------------------------------------------------- tiling

def _pick_batch_tile(batch, src_len, emb_dim, t_out, n_chan, max_fs):
    """Rows per grid step, tile count and a matching vmem_limit_bytes.

    Byte model accounts for lane padding (e.g. emb=32 -> 128 lanes in VMEM), the
    bf16 padded/im2col copies and the f32 conv activations; budget is derived
    per-generation from the physical VMEM (v7x only has 64 MiB)."""
    lanes = lambda n: -(-n // 128) * 128
    k_dim = max_fs * emb_dim
    s_pad = t_out + max_fs - 1
    per_row = (
        2 * src_len * lanes(emb_dim) * 4       # double-buffered f32 input tile
        + src_len * lanes(emb_dim) * 2         # in-kernel bf16 cast
        + s_pad * lanes(emb_dim) * 2           # zero-padded sequence copy
        + t_out * lanes(k_dim) * 2             # im2col LHS
        + 2 * t_out * lanes(n_chan) * 4        # f32 conv acc + masked copy
    )
    try:
        vmem_cap = int(pltpu.get_tpu_info().vmem_capacity_bytes)
    except Exception:                          # off-TPU / older jax: assume v7x (smallest)
        vmem_cap = 64 << 20
    budget = vmem_cap // 3                     # ~21 MiB on v7x, ~42 MiB on v5e/v6e
    tb = max(1, min(budget // max(per_row, 1), batch))
    if batch >= 4:                             # >= 4 grid steps -> 2 per TC on v7x megacore
        tb = min(tb, -(-batch // 4))
    n_tiles = -(-batch // tb)
    if n_tiles > 2 and n_tiles % 2:            # keep the two v7x TensorCores balanced
        tb_even = -(-batch // (n_tiles + 1))
        if (-(-batch // tb_even)) % 2 == 0:
            tb = tb_even
            n_tiles = -(-batch // tb)
    vmem_limit = min(vmem_cap, max(32 << 20, tb * per_row * 2 + (16 << 20)))
    return tb, n_tiles, vmem_limit


# --------------------------------------------------------------------------- weight prep

def prepare_cnn_encoder_params(conv_weights, out_w, out_b, filter_sizes, seq_len):
    """One-time weight fusion / re-layout for the Pallas kernel.

    conv_weights : list of [filter_num, 1, fs, emb_dim] Conv2d weights (MUST be bias-free,
                   as in the module: nn.Conv2d(..., bias=False); the masked max-pool trick
                   relies on it).
    out_w        : [hidden, filter_num * len(filter_sizes)] Linear weight
    out_b        : [hidden] Linear bias
    Returns (wim bf16 [max_fs*emb, n_chan], mask f32 [t_out_pad, n_chan],
             wo_pad f32 [n_chan, h_pad], bo_pad f32 [1, h_pad]).
    """
    filter_sizes = [int(fs) for fs in filter_sizes]
    filter_num = int(conv_weights[0].shape[0])
    emb_dim = int(conv_weights[0].shape[3])
    hidden = int(out_w.shape[0])
    n_chan = filter_num * len(filter_sizes)
    max_fs = max(filter_sizes)
    max_pad = max_fs // 2
    pads = [fs // 2 for fs in filter_sizes]
    h_outs = [seq_len + 2 * p - fs + 1 for fs, p in zip(filter_sizes, pads)]
    t_out = max(h_outs)
    t_out_pad = -(-t_out // 8) * 8            # sublane-aligned -> clean im2col reshape

    # Fused im2col weights: filter b's tap j lands at global tap (max_pad - pad_b) + j,
    # so with a left seq padding of max_pad every filter reads exactly what PyTorch's
    # Conv2d(padding=(fs//2, 0)) reads; positions t >= h_out_b are masked to -1e30.
    wcat = np.zeros((max_fs, emb_dim, n_chan), np.float32)
    mask = np.full((t_out_pad, n_chan), np.float32(-1e30), np.float32)
    for b, (fs, pad, h_out, w) in enumerate(zip(filter_sizes, pads, h_outs, conv_weights)):
        w = np.asarray(w, np.float32)
        assert w.shape == (filter_num, 1, fs, emb_dim)
        off = max_pad - pad
        w_b = np.transpose(w[:, 0, :, :], (1, 2, 0))            # [fs, emb, F]
        wcat[off:off + fs, :, b * filter_num:(b + 1) * filter_num] = w_b
        mask[:h_out, b * filter_num:(b + 1) * filter_num] = 0.0
    wim = wcat.reshape(max_fs * emb_dim, n_chan)                # rows = tap*emb + e

    h_pad = max(128, -(-hidden // 128) * 128)                   # lane-dense output width
    wo_pad = np.zeros((n_chan, h_pad), np.float32)
    wo_pad[:, :hidden] = np.asarray(out_w, np.float32).T
    bo_pad = np.zeros((1, h_pad), np.float32)
    bo_pad[0, :hidden] = np.asarray(out_b, np.float32)

    return (jnp.asarray(wim, jnp.bfloat16), jnp.asarray(mask, jnp.float32),
            jnp.asarray(wo_pad, jnp.float32), jnp.asarray(bo_pad, jnp.float32))


# --------------------------------------------------------------------------- wrapper

@functools.partial(jax.jit, static_argnames=("hidden",))
def cnn_encoder_forward(src, emb_table, wim, mask, wo_pad, bo_pad, *, hidden):
    """CNNEncoder.forward.  Returns (outputs [B, hidden], embedded [B, S, E])."""
    src_len, batch = src.shape
    emb_dim = emb_table.shape[1]
    k_dim, n_chan = wim.shape
    max_fs = k_dim // emb_dim
    t_out = mask.shape[0]
    h_pad = wo_pad.shape[1]
    s_pad = t_out + max_fs - 1
    if s_pad < (max_fs // 2) + src_len:
        raise ValueError("prepared params do not match src_len")

    # glue: embedding lookup (self.embeddings(src.transpose(0, 1)))
    # TODO(synk): gather stays in XLA; a Pallas version needs a manual DMA gather.
    embedded = jnp.take(emb_table, src.T, axis=0).astype(jnp.float32)   # [B, S, E]

    tb, n_tiles, vmem_limit = _pick_batch_tile(batch, src_len, emb_dim, t_out, n_chan, max_fs)
    b_pad = n_tiles * tb
    # The kernel consumes the f32 embedded tensor directly (bf16 cast + seq pad are
    # in-kernel); batch is only padded when it does not divide the tile.
    x = embedded if b_pad == batch else jnp.pad(
        embedded, ((0, b_pad - batch), (0, 0), (0, 0)))

    cost = pl.CostEstimate(
        flops=2 * b_pad * t_out * n_chan * k_dim + 2 * b_pad * n_chan * h_pad,
        transcendentals=b_pad * h_pad,
        bytes_accessed=(x.size * 4 + b_pad * h_pad * 4
                        + wim.size * 2 + mask.size * 4 + wo_pad.size * 4 + bo_pad.size * 4),
    )

    out = pl.pallas_call(
        _cnn_encoder_kernel,
        out_shape=jax.ShapeDtypeStruct((b_pad, h_pad), jnp.float32),
        grid=(n_tiles,),
        in_specs=[
            pl.BlockSpec((tb, src_len, emb_dim), lambda b: (b, 0, 0)),
            pl.BlockSpec(wim.shape, lambda b: (0, 0)),
            pl.BlockSpec(mask.shape, lambda b: (0, 0)),
            pl.BlockSpec(wo_pad.shape, lambda b: (0, 0)),
            pl.BlockSpec(bo_pad.shape, lambda b: (0, 0)),
        ],
        out_specs=pl.BlockSpec((tb, h_pad), lambda b: (b, 0)),
        compiler_params=pltpu.CompilerParams(
            dimension_semantics=("parallel",),        # batch tiles -> both TCs on v7x
            vmem_limit_bytes=int(vmem_limit),
        ),
        cost_estimate=cost,
    )(x, wim, mask, wo_pad, bo_pad)

    outputs = out[:batch, :hidden]
    return outputs, embedded


# --------------------------------------------------------------------------- reference

def _reference_forward(src, emb_table, conv_weights, out_w, out_b, filter_sizes,
                       conv_dtype=jnp.float32):
    """Pure-JAX reference replicating the PyTorch forward (conv inputs in conv_dtype)."""
    embedded = jnp.take(emb_table, src.T, axis=0).astype(jnp.float32)    # [B, S, E]
    x = embedded.astype(conv_dtype)[:, None, :, :]                       # NCHW [B,1,S,E]
    pooled = []
    for fs, w in zip(filter_sizes, conv_weights):
        conv = jax.lax.conv_general_dilated(
            x, w.astype(conv_dtype),
            window_strides=(1, 1),
            padding=[(fs // 2, fs // 2), (0, 0)],
            dimension_numbers=("NCHW", "OIHW", "NCHW"),
            preferred_element_type=jnp.float32,
        )                                                                # [B,F,H,1]
        feat = jnp.maximum(conv[..., 0], 0.0)                            # [B,F,H]
        pooled.append(jnp.max(feat, axis=2))                             # [B,F]
    cnn_feat = jnp.concatenate(pooled, axis=1)
    out = jnp.tanh(cnn_feat @ out_w.astype(jnp.float32).T
                   + out_b.astype(jnp.float32)[None, :])
    return out, embedded


# --------------------------------------------------------------------------- test

if __name__ == "__main__":
    # Small, module-consistent shapes.
    src_len, batch = 8, 2
    vocab, emb_dim = 50, 32
    filter_num = 64
    filter_sizes = [1, 2, 3, 4]
    hidden = 32

    key = jax.random.PRNGKey(0)
    k_emb, k_src, k_lin_w, k_lin_b, *k_convs = jax.random.split(key, 4 + len(filter_sizes))

    src = jax.random.randint(k_src, (src_len, batch), 0, vocab, dtype=jnp.int32)
    emb_table = jax.random.normal(k_emb, (vocab, emb_dim), dtype=jnp.float32)
    conv_weights = [
        0.1 * jax.random.normal(kc, (filter_num, 1, fs, emb_dim), dtype=jnp.float32)
        for kc, fs in zip(k_convs, filter_sizes)
    ]
    out_w = 0.1 * jax.random.normal(
        k_lin_w, (hidden, filter_num * len(filter_sizes)), dtype=jnp.float32)
    out_b = 0.1 * jax.random.normal(k_lin_b, (hidden,), dtype=jnp.float32)

    # one-time weight fusion / relayout (kept out of the per-call jitted path)
    wim, mask, wo_pad, bo_pad = prepare_cnn_encoder_params(
        conv_weights, out_w, out_b, filter_sizes, src_len)

    outputs, embedded = cnn_encoder_forward(
        src, emb_table, wim, mask, wo_pad, bo_pad, hidden=hidden)
    outputs = jax.block_until_ready(outputs)
    embedded = jax.block_until_ready(embedded)

    # bf16-matched reference (same matmul quantization as the kernel) -> tight check
    ref_bf16, ref_emb = _reference_forward(
        src, emb_table, conv_weights, out_w, out_b, filter_sizes,
        conv_dtype=jnp.bfloat16)
    # full-f32 reference -> sanity check within bf16 rounding error
    ref_f32, _ = _reference_forward(
        src, emb_table, conv_weights, out_w, out_b, filter_sizes,
        conv_dtype=jnp.float32)

    assert outputs.shape == (batch, hidden)
    assert embedded.shape == (batch, src_len, emb_dim)
    assert jnp.allclose(embedded, ref_emb, atol=1e-6, rtol=1e-6)
    assert jnp.allclose(outputs, ref_bf16, atol=1e-4, rtol=1e-4)
    assert jnp.allclose(outputs, ref_f32, atol=3e-2, rtol=3e-2)

    print("KERNEL_OK")
</pallas_src>

<mosaic_0001>
module attributes {stable_mosaic.version = 11 : i64} {
  func.func @_cnn_encoder_kernel(%arg0: i32, %arg1: memref<2x8x32xf32, #tpu.memory_space<vmem>>, %arg2: memref<128x256xbf16, #tpu.memory_space<vmem>>, %arg3: memref<16x256xf32, #tpu.memory_space<vmem>>, %arg4: memref<256x128xf32, #tpu.memory_space<vmem>>, %arg5: memref<1x128xf32, #tpu.memory_space<vmem>>, %arg6: memref<2x128xf32, #tpu.memory_space<vmem>>) attributes {dimension_semantics = [#tpu.dimension_semantics<parallel>], iteration_bounds = array<i64: 1>, scalar_prefetch = 0 : i64, scratch_operands = 0 : i64, tpu.core_type = #tpu.core_type<tc>, window_params = [{transform_indices = @transform_0, window_bounds = array<i64: 2, 8, 32>}, {pipeline_mode = #tpu.pipeline_mode<synchronous>, transform_indices = @transform_1, window_bounds = array<i64: 128, 256>}, {pipeline_mode = #tpu.pipeline_mode<synchronous>, transform_indices = @transform_2, window_bounds = array<i64: 16, 256>}, {pipeline_mode = #tpu.pipeline_mode<synchronous>, transform_indices = @transform_3, window_bounds = array<i64: 256, 128>}, {pipeline_mode = #tpu.pipeline_mode<synchronous>, transform_indices = @transform_4, window_bounds = array<i64: 1, 128>}, {transform_indices = @transform_5, window_bounds = array<i64: 2, 128>}]} {
    %c0 = arith.constant 0 : index
    %c0_0 = arith.constant 0 : index
    %c0_1 = arith.constant 0 : index
    %0 = vector.load %arg1[%c0, %c0_0, %c0_1] : memref<2x8x32xf32, #tpu.memory_space<vmem>>, vector<2x8x32xf32>
    %1 = arith.truncf %0 : vector<2x8x32xf32> to vector<2x8x32xbf16>
    %cst = arith.constant 0.000000e+00 : bf16
    %2 = vector.broadcast %cst : bf16 to vector<2x2x32xbf16>
    %cst_2 = arith.constant 0.000000e+00 : bf16
    %3 = vector.broadcast %cst_2 : bf16 to vector<2x9x32xbf16>
    %4 = tpu.concatenate %2, %1, %3 in 1 : vector<2x2x32xbf16>, vector<2x8x32xbf16>, vector<2x9x32xbf16> -> vector<2x19x32xbf16>
    %5 = vector.extract_strided_slice %4 {offsets = [0, 0, 0], sizes = [2, 16, 32], strides = [1, 1, 1]} : vector<2x19x32xbf16> to vector<2x16x32xbf16>
    %6 = vector.extract_strided_slice %4 {offsets = [0, 1, 0], sizes = [2, 16, 32], strides = [1, 1, 1]} : vector<2x19x32xbf16> to vector<2x16x32xbf16>
    %7 = vector.extract_strided_slice %4 {offsets = [0, 2, 0], sizes = [2, 16, 32], strides = [1, 1, 1]} : vector<2x19x32xbf16> to vector<2x16x32xbf16>
    %8 = vector.extract_strided_slice %4 {offsets = [0, 3, 0], sizes = [2, 16, 32], strides = [1, 1, 1]} : vector<2x19x32xbf16> to vector<2x16x32xbf16>
    %9 = tpu.concatenate %5, %6, %7, %8 in 2 : vector<2x16x32xbf16>, vector<2x16x32xbf16>, vector<2x16x32xbf16>, vector<2x16x32xbf16> -> vector<2x16x128xbf16>
    %10 = vector.shape_cast %9 : vector<2x16x128xbf16> to vector<32x128xbf16>
    %c0_3 = arith.constant 0 : index
    %c0_4 = arith.constant 0 : index
    %11 = vector.load %arg2[%c0_3, %c0_4] : memref<128x256xbf16, #tpu.memory_space<vmem>>, vector<128x256xbf16>
    %cst_5 = arith.constant dense<0.000000e+00> : vector<32x256xf32>
    %12 = tpu.matmul %10, %11, %cst_5 {dimension_numbers = #tpu.dot_dimension_numbers<[1], [0], [0], [1], [0, 0, 1, 1], [], []>} : vector<32x128xbf16>, vector<128x256xbf16>, vector<32x256xf32> -> vector<32x256xf32>
    %13 = vector.shape_cast %12 : vector<32x256xf32> to vector<2x16x256xf32>
    %c0_6 = arith.constant 0 : index
    %c0_7 = arith.constant 0 : index
    %14 = vector.load %arg3[%c0_6, %c0_7] : memref<16x256xf32, #tpu.memory_space<vmem>>, vector<16x256xf32>
    %15 = vector.shape_cast %14 : vector<16x256xf32> to vector<1x16x256xf32>
    %16 = vector.broadcast %15 : vector<1x16x256xf32> to vector<2x16x256xf32>
    %17 = arith.addf %13, %16 : vector<2x16x256xf32>
    %cst_8 = arith.constant dense<0xFF800000> : vector<2x256xf32>
    %18 = vector.multi_reduction <maximumf>, %17, %cst_8 [1] : vector<2x16x256xf32> to vector<2x256xf32>
    %cst_9 = arith.constant 0.000000e+00 : f32
    %19 = vector.broadcast %cst_9 : f32 to vector<2x256xf32>
    %20 = arith.maximumf %18, %19 : vector<2x256xf32>
    %c0_10 = arith.constant 0 : index
    %c0_11 = arith.constant 0 : index
    %21 = vector.load %arg4[%c0_10, %c0_11] : memref<256x128xf32, #tpu.memory_space<vmem>>, vector<256x128xf32>
    %cst_12 = arith.constant dense<0.000000e+00> : vector<2x128xf32>
    %22 = tpu.matmul %20, %21, %cst_12 {dimension_numbers = #tpu.dot_dimension_numbers<[1], [0], [0], [1], [0, 0, 1, 1], [], []>} : vector<2x256xf32>, vector<256x128xf32>, vector<2x128xf32> -> vector<2x128xf32>
    %c0_13 = arith.constant 0 : index
    %c0_14 = arith.constant 0 : index
    %23 = vector.load %arg5[%c0_13, %c0_14] : memref<1x128xf32, #tpu.memory_space<vmem>>, vector<1x128xf32>
    %24 = vector.broadcast %23 : vector<1x128xf32> to vector<2x128xf32>
    %25 = arith.addf %22, %24 : vector<2x128xf32>
    %26 = math.tanh %25 : vector<2x128xf32>
    %c0_15 = arith.constant 0 : index
    %c0_16 = arith.constant 0 : index
    %27 = vector.load %arg6[%c0_15, %c0_16] : memref<2x128xf32, #tpu.memory_space<vmem>>, vector<2x128xf32>
    tpu.vector_store %arg6[%c0_15, %c0_16], %26 {strides = array<i32>} : memref<2x128xf32, #tpu.memory_space<vmem>>, vector<2x128xf32>,
    return
  }
  func.func @transform_0(%arg0: i32) -> (i32, i32, i32) {
    %c0_i32 = arith.constant 0 : i32
    %c0_i32_0 = arith.constant 0 : i32
    %c0_i32_1 = arith.constant 0 : i32
    return %arg0, %c0_i32, %c0_i32_0 : i32, i32, i32
  }
  func.func @transform_1(%arg0: i32) -> (i32, i32) {
    %c0_i32 = arith.constant 0 : i32
    %c0_i32_0 = arith.constant 0 : i32
    %c0_i32_1 = arith.constant 0 : i32
    return %c0_i32, %c0_i32_0 : i32, i32
  }
  func.func @transform_2(%arg0: i32) -> (i32, i32) {
    %c0_i32 = arith.constant 0 : i32
    %c0_i32_0 = arith.constant 0 : i32
    %c0_i32_1 = arith.constant 0 : i32
    return %c0_i32, %c0_i32_0 : i32, i32
  }
  func.func @transform_3(%arg0: i32) -> (i32, i32) {
    %c0_i32 = arith.constant 0 : i32
    %c0_i32_0 = arith.constant 0 : i32
    %c0_i32_1 = arith.constant 0 : i32
    return %c0_i32, %c0_i32_0 : i32, i32
  }
  func.func @transform_4(%arg0: i32) -> (i32, i32) {
    %c0_i32 = arith.constant 0 : i32
    %c0_i32_0 = arith.constant 0 : i32
    %c0_i32_1 = arith.constant 0 : i32
    return %c0_i32, %c0_i32_0 : i32, i32
  }
  func.func @transform_5(%arg0: i32) -> (i32, i32) {
    %c0_i32 = arith.constant 0 : i32
    %c0_i32_0 = arith.constant 0 : i32
    return %arg0, %c0_i32 : i32, i32
  }
}

</mosaic_0001>

<bundles_post_ra>
// kernel: cnn_encoder_forward.1
= control target key start
LH: loop header
LB: loop body
LE: loop exit
PB: predicated region body
PF: predicated region fallthrough
CT: control target
= control target key end

     0   :  { %10 = vsyncpa [#allocation3], 0  ;;  %s775_s0 = inlined_call_operand.vmem [shape: f32[2,8,32], index: 0, kind: input, shape index: {}]   ;;  %s776_s1 = inlined_call_operand.hbm [shape: bf16[128,256], index: 1, kind: input, shape index: {}]   ;;  %s777_s2 = inlined_call_operand.hbm [shape: f32[16,256], index: 2, kind: input, shape index: {}]   ;;  %s778_s3 = inlined_call_operand.vmem [shape: f32[256,128], index: 3, kind: input, shape index: {}]   ;;  %s779_s4 = inlined_call_operand.vmem [shape: f32[1,128], index: 4, kind: input, shape index: {}]   ;;  %s780_s5 = inlined_call_operand.hbm [shape: f32[2,128], index: 5, kind: output, shape index: {}]  }
   0x1   :  { %11 = vsyncpa [#allocation6], 0 }
   0x2   :  { %12 = vsyncpa [#allocation4], 0  ;;  %s19_s20 = sshll.u32 %s776_s1, 4  ;;  %s600_s21 = smov [#allocation2]   ;;  %s20_s20 = int_to_ptr.hbm [resolvable:$true] %s19_s20 }
   0x3   :  { %s21_s22 = sshll.u32 %s600_s21, 4  ;;  %s32_s25 = sshll.u32 %s777_s2, 4  ;;  %s22_s22 = int_to_ptr.vmem [resolvable:$true] %s21_s22  ;;  %s33_s25 = int_to_ptr.hbm [resolvable:$true] %s32_s25 }
   0x4   :  { %s601_s26 = smov 128   ;;  %s602_s27 = smov 8  }
   0x5   :  { %27 = dma.hbm_to_vmem [thread:$0]  %s20_s20, 2048, %s22_s22, [#allocation3], %s601_s26, %s601_s26, %s602_s27  }
   0x6   :  { %s603_s28 = smov [#allocation5]   ;;  %s604_s30 = smov 256  }
   0x7   :  { %s34_s29 = sshll.u32 %s603_s28, 4  ;;  %s605_s6 = smov 16   ;;  %s35_s29 = int_to_ptr.vmem [resolvable:$true] %s34_s29 }
   0x8   :  { %40 = dma.hbm_to_vmem [thread:$0]  %s33_s25, 512, %s35_s29, [#allocation6], %s604_s30, %s604_s30, %s605_s6  }
   0x9   :  { %594 = dma.done.wait [#allocation3], 2048  }
   0xa   :  { %595 = vsyncadd [#allocation3], 4294965248 }
   0xb   :  { %596 = dma.done.wait [#allocation6], 512  }
   0xc   :  { %597 = vsyncadd [#allocation6], 4294966784  ;;  %v54_v0 = vld [vmem:[%s775_s0] sm:$0xff]  ;;  %v55_v1 = vld [vmem:[%s775_s0 + $0x8] sm:$0xff]  ;;  %vm66_vm0 = vcmask 1040384   ;;  %vm72_vm1 = vcmask 1044480  }
   0xd   :  { %v486_v2 = vld [vmem:[#allocation2 + $0x70] sm:$0xf]  ;;  %v56_v3 = vpack.c.bf16 %v54_v0, %v54_v0  ;;  %v57_v4 = vpack.c.bf16 %v55_v1, %v55_v1  ;;  %v507_v5 = vld [vmem:[#allocation2 + $0x74] sm:$0xf0]  ;;  %v506_v6 = vld [vmem:[#allocation2 + $0x74] sm:$0xf] }
   0xe   :  { %v488_v7 = vld [vmem:[#allocation2 + $0x78] sm:$0xf0]  ;;  %v487_v8 = vor.u32 %v507_v5, %v486_v2  ;;  %v478_v10 = vld [vmem:[#allocation2 + $0x60] sm:$0xf]  ;;  %v505_v11 = vld [vmem:[#allocation2 + $0x64] sm:$0xf0] }
   0xf   :  { %v491_v9 = vor.u32 %v506_v6, %v488_v7  ;;  %v504_v12 = vld [vmem:[#allocation2 + $0x64] sm:$0xf]  ;;  %v60_v13 = vunpack.c.l.b16 %v56_v3  ;;  %v61_v14 = vunpack.c.l.b16 %v57_v4  ;;  %v480_v15 = vld [vmem:[#allocation2 + $0x68] sm:$0xf0]  ;;  %v479_v16 = vor.u32 %v505_v11, %v478_v10  ;;  %v470_v18 = vld [vmem:[#allocation2 + $0x50] sm:$0xf] }
  0x10   :  { %241 = vmatpush.bf16.msra.mxu0 %v487_v8  ;;  %v483_v17 = vor.u32 %v504_v12, %v480_v15  ;;  %v503_v21 = vld [vmem:[#allocation2 + $0x54] sm:$0xf0]  ;;  %v502_v22 = vld [vmem:[#allocation2 + $0x54] sm:$0xf]  ;;  %v472_v23 = vld [vmem:[#allocation2 + $0x58] sm:$0xf0] }
  0x11   :  { %260 = vmatpush.bf16.msra.mxu1 %v491_v9  ;;  %v62_v19 = vpack.c.b16 %v60_v13, %v60_v13  ;;  %v63_v20 = vpack.c.b16 %v61_v14, %v61_v14  ;;  %vm75_vm2 = vsmask.f32 7424  ;;  %v606_v25 = vmov 0   ;;  %v462_v30 = vld [vmem:[#allocation2 + $0x40] sm:$0xf]  ;;  %s607_s0 = smov 64  }
  0x12   :  { %v117_v26 = vrot.slane %v606_v25, 2  ;;  %v471_v28 = vor.u32 %v503_v21, %v470_v18  ;;  %v475_v29 = vor.u32 %v502_v22, %v472_v23  ;;  %v501_v31 = vld [vmem:[#allocation2 + $0x44] sm:$0xf0]  ;;  %v500_v32 = vld [vmem:[#allocation2 + $0x44] sm:$0xf]  ;;  %v84_v37 = vrot.slane %v606_v25, 1 }
  0x13   :  { %v64_v24 = vrot.slane %v62_v19, 7  ;;  %v65_v27 = vrot.slane %v63_v20, 7  ;;  %v464_v35 = vld [vmem:[#allocation2 + $0x48] sm:$0xf0]  ;;  %vm100_vm3 = vcmask 1046528   ;;  %v463_v41 = vor.u32 %v501_v31, %v462_v30  ;;  %s608_s9 = smov 32  }
  0x14   :  { %242 = vmatpush.bf16.msra.mxu0 %v479_v16  ;;  %v454_v42 = vld [vmem:[#allocation2 + $0x30] sm:$0xf]  ;;  %v499_v43 = vld [vmem:[#allocation2 + $0x34] sm:$0xf0]  ;;  %v467_v47 = vor.u32 %v500_v32, %v464_v35  ;;  %v498_v48 = vld [vmem:[#allocation2 + $0x34] sm:$0xf]  ;;  %v118_v52 = vor.u32 %v117_v26, %v84_v37 }
  0x15   :  { %261 = vmatpush.bf16.msra.mxu1 %v483_v17  ;;  %v69_v33 = vsel %vm66_vm0, 0, %v64_v24  ;;  %v71_v34 = vsel %vm66_vm0, 0, %v65_v27  ;;  %v456_v53 = vld [vmem:[#allocation2 + $0x38] sm:$0xf0]  ;;  %vm110_vm4 = vsmask.f32 6400  ;;  %v455_v61 = vor.u32 %v499_v43, %v454_v42 }
  0x16   :  { %v654_v36 = vsel %vm72_vm1, %v69_v33, 0  ;;  %v657_v38 = vsel %vm72_vm1, %v71_v34, 0  ;;  %v459_v62 = vor.u32 %v498_v48, %v456_v53  ;;  %v446_v63 = vld [vmem:[#allocation2 + $0x20] sm:$0xf]  ;;  %v497_v2 = vld [vmem:[#allocation2 + $0x24] sm:$0xf0] }
  0x17   :  { %v76_v39 = vshrl.u32 %v654_v36, 16  ;;  %v78_v40 = vshll.u32 %v654_v36, 16  ;;  %v86_v44 = vshrl.u32 %v657_v38, 16  ;;  %v88_v45 = vshll.u32 %v657_v38, 16  ;;  %v496_v3 = vld [vmem:[#allocation2 + $0x24] sm:$0xf] }
  0x18   :  { %v104_v46 = vrot.slane %v657_v38, 1  ;;  %243 = vmatpush.bf16.msra.mxu0 %v471_v28  ;;  %v448_v4 = vld [vmem:[#allocation2 + $0x28] sm:$0xf0]  ;;  %s609_s10 = smov 96   ;;  %v101_v5 = vrot.slane %v654_v36, 1  ;;  %v447_v8 = vor.u32 %v497_v2, %v446_v63  ;;  %vm128_vm5 = vcmask 261120  }
  0x19   :  { %262 = vmatpush.bf16.msra.mxu1 %v475_v29  ;;  %v80_v49 = vrot.slane %v78_v40, 1  ;;  %v111_v50 = vrot.slane %v76_v39, 1  ;;  %v112_v51 = vrot.slane %v78_v40, 2  ;;  %v120_v55 = vrot.slane %v86_v44, 1  ;;  %v438_v12 = vld [vmem:[#allocation2 + $0x10] sm:$0xf] }
  0x1a   :  { %v105_v54 = vsel %vm100_vm3, %v104_v46, %v84_v37  ;;  %v121_v56 = vrot.slane %v88_v45, 2  ;;  %v90_v59 = vrot.slane %v88_v45, 1  ;;  %v451_v9 = vor.u32 %v496_v3, %v448_v4  ;;  %v495_v13 = vld [vmem:[#allocation2 + $0x14] sm:$0xf0]  ;;  %v494_v14 = vld [vmem:[#allocation2 + $0x14] sm:$0xf] }
  0x1b   :  { %v81_v57 = vor.u32 %v80_v49, %v76_v39  ;;  %v113_v58 = vor.u32 %v112_v51, %v111_v50  ;;  %108 = vrot.lane.b32.xlu2 %v105_v54, %s607_s0  ;;  %v103_v10 = vsel %vm100_vm3, %v101_v5, %v84_v37  ;;  %v439_v15 = vor.u32 %v495_v13, %v438_v12  ;;  %v440_v16 = vld [vmem:[#allocation2 + $0x18] sm:$0xf0]  ;;  %v430_v17 = vld [vmem:[#allocation2] sm:$0xf]  ;;  %v493_v18 = vld [vmem:[#allocation2 + $0x4] sm:$0xf0] }
  0x1c   :  { %v122_v60 = vor.u32 %v121_v56, %v120_v55  ;;  %244 = vmatpush.bf16.msra.mxu0 %v463_v41  ;;  %v91_v6 = vor.u32 %v90_v59, %v86_v44  ;;  %v443_v19 = vor.u32 %v494_v14, %v440_v16  ;;  %v492_v20 = vld [vmem:[#allocation2 + $0x4] sm:$0xf]  ;;  %v432_v21 = vld [vmem:[#allocation2 + $0x8] sm:$0xf0]  ;;  %v431_v22 = vor.u32 %v493_v18, %v430_v17  ;;  %v337_v39 = vld [vmem:[%s778_s3 + $0x70] sm:$0xff]  ;;  %s610_s20 = smov [#allocation7]  }
  0x1d   :  { %263 = vmatpush.bf16.msra.mxu1 %v467_v47  ;;  %v85_v0 = vsel %vm75_vm2, %v81_v57, %v84_v37  ;;  %v119_v1 = vsel %vm110_vm4, %v113_v58, %v118_v52  ;;  %v435_v23 = vor.u32 %v492_v20, %v432_v21  ;;  %vm133_vm6 = vcmask 523264   ;;  %v336_v40 = vld [vmem:[%s778_s3 + $0x68] sm:$0xff]  ;;  %v335_v42 = vld [vmem:[%s778_s3 + $0x60] sm:$0xff]  ;;  %v334_v44 = vld [vmem:[%s778_s3 + $0x58] sm:$0xff]  ;;  %s415_s21 = sshll.u32 %s610_s20, 4  ;;  %s417_s24 = sshll.u32 %s780_s5, 4  ;;  %s416_s21 = int_to_ptr.vmem [resolvable:$true] %s415_s21  ;;  %s418_s24 = int_to_ptr.hbm [resolvable:$true] %s417_s24 }
  0x1e   :  { %93 = vrot.lane.b32.xlu0 %v85_v0, %s608_s9  ;;  %124 = vrot.lane.b32.xlu1 %v119_v1, %s609_s10  ;;  %v123_v7 = vsel %vm110_vm4, %v122_v60, %v118_v52  ;;  %v92_v11 = vsel %vm75_vm2, %v91_v6, %v84_v37  ;;  %vm138_vm7 = vcmask 785408   ;;  %v338_v37 = vld [vmem:[%s778_s3 + $0x78] sm:$0xff]  ;;  %v352_v41 = vld [vmem:[%s778_s3 + $0xe8] sm:$0xff]  ;;  %v281_v2 = vld [vmem:[#allocation5 + $0x10] sm:$0xff]  ;;  %vm363_vm8 = vcmask 1041409  }
  0x1f   :  { %368 = vmatpush.msra.mxu2 %v338_v37  ;;  %v351_v43 = vld [vmem:[%s778_s3 + $0xe0] sm:$0xff]  ;;  %v350_v45 = vld [vmem:[%s778_s3 + $0xd8] sm:$0xff]  ;;  %v333_v46 = vld [vmem:[%s778_s3 + $0x50] sm:$0xff] }
  0x20   :  { %245 = vmatpush.bf16.msra.mxu0 %v455_v61  ;;  %v349_v47 = vld [vmem:[%s778_s3 + $0xd0] sm:$0xff]  ;;  %v332_v48 = vld [vmem:[%s778_s3 + $0x48] sm:$0xff]  ;;  %v331_v50 = vld [vmem:[%s778_s3 + $0x40] sm:$0xff] }
  0x21   :  { %264 = vmatpush.bf16.msra.mxu1 %v459_v62  ;;  %369 = vmatpush.msra.mxu2 %v337_v39  ;;  %v348_v49 = vld [vmem:[%s778_s3 + $0xc8] sm:$0xff]  ;;  %v347_v51 = vld [vmem:[%s778_s3 + $0xc0] sm:$0xff]  ;;  %v330_v52 = vld [vmem:[%s778_s3 + $0x38] sm:$0xff] }
  0x22   :  { %v346_v53 = vld [vmem:[%s778_s3 + $0xb8] sm:$0xff]  ;;  %v329_v54 = vld [vmem:[%s778_s3 + $0x30] sm:$0xff]  ;;  %v328_v58 = vld [vmem:[%s778_s3 + $0x28] sm:$0xff] }
  0x23   :  { %126 = vrot.lane.b32.xlu2 %v123_v7, %s609_s10  ;;  %370 = vmatpush.msra.mxu2 %v336_v40  ;;  %v345_v55 = vld [vmem:[%s778_s3 + $0xb0] sm:$0xff]  ;;  %v344_v59 = vld [vmem:[%s778_s3 + $0xa8] sm:$0xff]  ;;  %v327_v60 = vld [vmem:[%s778_s3 + $0x20] sm:$0xff] }
  0x24   :  { %246 = vmatpush.bf16.msra.mxu0 %v447_v8  ;;  %v343_v61 = vld [vmem:[%s778_s3 + $0xa0] sm:$0xff]  ;;  %v326_v62 = vld [vmem:[%s778_s3 + $0x18] sm:$0xff]  ;;  %v325_v0 = vld [vmem:[%s778_s3 + $0x10] sm:$0xff] }
  0x25   :  { %265 = vmatpush.bf16.msra.mxu1 %v451_v9  ;;  %371 = vmatpush.msra.mxu2 %v335_v42  ;;  %v342_v63 = vld [vmem:[%s778_s3 + $0x98] sm:$0xff]  ;;  %v341_v1 = vld [vmem:[%s778_s3 + $0x90] sm:$0xff]  ;;  %v324_v4 = vld [vmem:[%s778_s3 + $0x8] sm:$0xff] }
  0x26   :  { %106 = vrot.lane.b32.xlu0 %v103_v10, %s607_s0  ;;  %95 = vrot.lane.b32.xlu1 %v92_v11, %s608_s9  ;;  %v282_v3 = vld [vmem:[#allocation5 + $0x18] sm:$0xff]  ;;  %v340_v5 = vld [vmem:[%s778_s3 + $0x88] sm:$0xff]  ;;  %v279_v6 = vld [vmem:[#allocation5] sm:$0xff] }
  0x27   :  { %372 = vmatpush.msra.mxu2 %v334_v44  ;;  %v280_v7 = vld [vmem:[#allocation5 + $0x8] sm:$0xff]  ;;  %v323_v10 = vld [vmem:[%s778_s3] sm:$0xff] }
  0x28   :  { %247 = vmatpush.bf16.msra.mxu0 %v439_v15  ;;  %v339_v11 = vld [vmem:[%s778_s3 + $0x80] sm:$0xff] }
  0x29   :  { %266 = vmatpush.bf16.msra.mxu1 %v443_v19  ;;  %373 = vmatpush.msra.mxu2 %v333_v46 }
  0x2b   :  { %374 = vmatpush.msra.mxu2 %v332_v48 }
  0x2c   :  { %248 = vmatpush.bf16.msra.mxu0 %v431_v22 }
  0x2d   :  { %267 = vmatpush.bf16.msra.mxu1 %v435_v23  ;;  %375 = vmatpush.msra.mxu2 %v331_v50 }
  0x2f   :  { %376 = vmatpush.msra.mxu2 %v330_v52 }
  0x31   :  { %377 = vmatpush.msra.mxu2 %v329_v54 }
  0x33   :  { %378 = vmatpush.msra.mxu2 %v328_v58  ;;  %v519_v58 = vld [vmem:[%s779_s4] ss:$0 sm:$0xff] }
  0x35   :  { %379 = vmatpush.msra.mxu2 %v327_v60 }
  0x37   :  { %380 = vmatpush.msra.mxu2 %v326_v62 }
  0x39   :  { %381 = vmatpush.msra.mxu2 %v325_v0 }
  0x3b   :  { %382 = vmatpush.msra.mxu2 %v324_v4 }
  0x3d   :  { %383 = vmatpush.msra.mxu2 %v323_v10 }
  0x75   :  { %v109_v30 = vpop.permute.xlu2 %108 }
  0x7d   :  { %v127_v33 = vpop.permute.xlu2 %126 }
  0x90   :  { %v94_v24 = vpop.permute.xlu0 %93  ;;  %v125_v25 = vpop.permute.xlu1 %124 }
  0x91   :  { %v130_v26 = vsel %vm128_vm5, %v654_v36, %v94_v24  ;;  %v354_v36 = vld [vmem:[%s778_s3 + $0xf8] sm:$0xff] }
  0x92   :  { %388 = vmatpush.msra.mxu3 %v354_v36 }
  0x98   :  { %v107_v27 = vpop.permute.xlu0 %106  ;;  %v96_v31 = vpop.permute.xlu1 %95 }
  0x99   :  { %v135_v28 = vsel %vm133_vm6, %v130_v26, %v107_v27  ;;  %v132_v32 = vsel %vm128_vm5, %v657_v38, %v96_v31  ;;  %v353_v38 = vld [vmem:[%s778_s3 + $0xf0] sm:$0xff] }
  0x9a   :  { %v140_v29 = vsel %vm138_vm7, %v135_v28, %v125_v25  ;;  %v137_v34 = vsel %vm133_vm6, %v132_v32, %v109_v30  ;;  %389 = vmatpush.msra.mxu3 %v353_v38 }
  0x9b   :  { %249 = vmatmul.bf16.vlgmr.msra.gmra.mxu0 %v140_v29  ;;  %268 = vmatmul.bf16.vlgmr.msra.gmra.mxu1 %v140_v29  ;;  %v143_v35 = vsel %vm138_vm7, %v137_v34, %v127_v33 }
  0x9c   :  { %390 = vmatpush.msra.mxu3 %v352_v41 }
  0x9e   :  { %391 = vmatpush.msra.mxu3 %v351_v43 }
  0xa0   :  { %392 = vmatpush.msra.mxu3 %v350_v45 }
  0xa2   :  { %393 = vmatpush.msra.mxu3 %v349_v47 }
  0xa4   :  { %394 = vmatpush.msra.mxu3 %v348_v49 }
  0xa6   :  { %395 = vmatpush.msra.mxu3 %v347_v51 }
  0xa8   :  { %396 = vmatpush.msra.mxu3 %v346_v53 }
  0xaa   :  { %397 = vmatpush.msra.mxu3 %v345_v55 }
  0xab   :  { %254 = vmatmul.bf16.gmra.mxu0 %v143_v35  ;;  %273 = vmatmul.bf16.gmra.mxu1 %v143_v35 }
  0xac   :  { %398 = vmatpush.msra.mxu3 %v344_v59 }
  0xae   :  { %399 = vmatpush.msra.mxu3 %v343_v61 }
  0xb0   :  { %400 = vmatpush.msra.mxu3 %v342_v63 }
  0xb2   :  { %401 = vmatpush.msra.mxu3 %v341_v1 }
  0xb4   :  { %402 = vmatpush.msra.mxu3 %v340_v5 }
  0xb6   :  { %403 = vmatpush.msra.mxu3 %v339_v11 }
 0x118   :  { %v250_v56 = vpop.f32.mrf.mxu0  ;;  %v269_v57 = vpop.f32.mrf.mxu1 }
 0x119   :  { %v283_v14 = vadd.f32 %v279_v6, %v250_v56  ;;  %v284_v15 = vadd.f32 %v280_v7, %v269_v57 }
 0x120   :  { %v252_v8 = vpop.f32.mrf.mxu0  ;;  %v271_v9 = vpop.f32.mrf.mxu1 }
 0x121   :  { %v285_v12 = vadd.f32 %v281_v2, %v252_v8  ;;  %v286_v13 = vadd.f32 %v282_v3, %v271_v9 }
 0x123   :  { %v291_v16 = vmax.f32 %v283_v14, %v285_v12  ;;  %v298_v17 = vmax.f32 %v284_v15, %v286_v13 }
 0x125   :  { %v292_v18 = vrot.slane %v291_v16, 4  ;;  %v299_v19 = vrot.slane %v298_v17, 4 }
 0x127   :  { %v293_v22 = vmax.f32 %v291_v16, %v292_v18  ;;  %v300_v23 = vmax.f32 %v298_v17, %v299_v19 }
 0x128   :  { %v255_v20 = vpop.f32.mrf.mxu0  ;;  %v274_v21 = vpop.f32.mrf.mxu1 }
 0x129   :  { %v294_v24 = vrot.slane %v293_v22, 2  ;;  %v301_v25 = vrot.slane %v300_v23, 2  ;;  %v287_v28 = vadd.f32 %v279_v6, %v255_v20  ;;  %v288_v29 = vadd.f32 %v280_v7, %v274_v21 }
 0x12b   :  { %v295_v34 = vmax.f32 %v293_v22, %v294_v24  ;;  %v302_v35 = vmax.f32 %v300_v23, %v301_v25 }
 0x12d   :  { %v296_v42 = vrot.slane %v295_v34, 1  ;;  %v303_v43 = vrot.slane %v302_v35, 1 }
 0x12f   :  { %v297_v46 = vmax.f32 %v295_v34, %v296_v42  ;;  %v304_v48 = vmax.f32 %v302_v35, %v303_v43 }
 0x130   :  { %v257_v26 = vpop.f32.mrf.mxu0  ;;  %v276_v27 = vpop.f32.mrf.mxu1 }
 0x131   :  { %v289_v30 = vadd.f32 %v281_v2, %v257_v26  ;;  %v290_v31 = vadd.f32 %v282_v3, %v276_v27  ;;  %v319_v52 = vmax.f32 %v297_v46, 0.0  ;;  %v320_v54 = vmax.f32 %v304_v48, 0.0 }
 0x133   :  { %v305_v32 = vmax.f32 %v287_v28, %v289_v30  ;;  %v312_v33 = vmax.f32 %v288_v29, %v290_v31 }
 0x135   :  { %v306_v37 = vrot.slane %v305_v32, 4  ;;  %v313_v36 = vrot.slane %v312_v33, 4 }
 0x137   :  { %v307_v39 = vmax.f32 %v305_v32, %v306_v37  ;;  %v314_v38 = vmax.f32 %v312_v33, %v313_v36 }
 0x139   :  { %v308_v40 = vrot.slane %v307_v39, 2  ;;  %v315_v41 = vrot.slane %v314_v38, 2 }
 0x13b   :  { %v309_v44 = vmax.f32 %v307_v39, %v308_v40  ;;  %v316_v45 = vmax.f32 %v314_v38, %v315_v41 }
 0x13d   :  { %v310_v47 = vrot.slane %v309_v44, 1  ;;  %v317_v49 = vrot.slane %v316_v45, 1 }
 0x13f   :  { %v311_v50 = vmax.f32 %v309_v44, %v310_v47  ;;  %v318_v51 = vmax.f32 %v316_v45, %v317_v49 }
 0x141   :  { %v321_v53 = vmax.f32 %v311_v50, 0.0  ;;  %v322_v55 = vmax.f32 %v318_v51, 0.0 }
 0x143   :  { %v364_v56 = vsel %vm363_vm8, %v321_v53, %v319_v52  ;;  %v365_v57 = vsel %vm363_vm8, %v322_v55, %v320_v54 }
 0x144   :  { %384 = vmatmul.f32.vlgmr.msra.gmra.mxu2 %v364_v56  ;;  %404 = vmatmul.f32.vlgmr.msra.gmra.mxu3 %v365_v57 }
 0x1c7   :  { %v385_v59 = vpop.f32.mrf.mxu2  ;;  %v405_v61 = vpop.f32.mrf.mxu3 }
 0x1c8   :  { %v386_v60 = vadd.f32 %v519_v58, %v385_v59 }
 0x1ca   :  { %v406_v62 = vadd.f32 %v405_v61, %v386_v60 }
 0x1cc   :  { %520 = vtanh.f32 %v406_v62 }
 0x1d2   :  { %v521_v63 = vpop.eup %520 }
 0x1d3   :  { %409 = vst [vmem:[#allocation7] sm:$0x3] %v521_v63 }
 0x1d4   :  { %420 = dma.vmem_to_hbm [thread:$0]  %s416_s21, 32, %s418_s24, [#allocation4]  }
 0x1d5   :  { %598 = dma.done.wait [#allocation4], 32  }
 0x1d6   :  { %599 = vsyncadd [#allocation4], 4294967264 }
 0x1d7   :  { %425 = vsyncpa [#allocation3], 1 }
 0x1d8   :  { %426 = vsyncpa [#allocation6], 1 }
 0x1d9   :  { %427 = vsyncpa [#allocation4], 1 }

</bundles_post_ra>
